<compile_context>
chip_gen: v7x
topology: tpu7x:2x2x1
jax: 0.10.0
libtpu: 0.0.40
codegen_flags: <defaults>
</compile_context>

<pallas_src>
import math

import jax
import jax.numpy as jnp
import numpy as np
from jax import lax
from jax.experimental import pallas as pl
from jax.experimental.pallas import tpu as pltpu

EPS = 1e-12


# ------------------------------ Pallas kernels ------------------------------ #

def lora_kernel_fullk(x_ref, w_ref, xa_ref, b3_ref, bias_ref, o_ref):
    """Full-Din variant: one grid step -> one (TS, TN) output tile.

    x_ref   : (TS, Din)  input tile (compute dtype)
    w_ref   : (TN, Din)  base-weight slab, native (Dout, Din) layout (no .T copy)
    xa_ref  : (TS, r)    precomputed x @ A_b tile (f32)
    b3_ref  : (r, TN)    mixed LoRA-B tile (f32, 1/r scaling folded in)
    bias_ref: (1, TN)    f32 bias tile
    o_ref   : (TS, TN)   output tile
    """
    base = lax.dot_general(
        x_ref[...], w_ref[...], dimension_numbers=(((1,), (1,)), ((), ())),
        preferred_element_type=jnp.float32)
    lora = jnp.dot(xa_ref[...], b3_ref[...], preferred_element_type=jnp.float32)
    o_ref[...] = (base + bias_ref[...] + lora).astype(o_ref.dtype)


def lora_kernel_ksplit(x_ref, w_ref, xa_ref, b3_ref, bias_ref, o_ref, acc_ref):
    """K-split variant: Din is tiled; acc_ref carries the f32 partial across k.

    Bias is folded into the k==0 accumulator init; the tiny (TS, r)@(r, TN) LoRA
    contraction runs once in the k==last epilogue, in f32.
    """
    k = pl.program_id(3)

    @pl.when(k == 0)
    def _():
        acc_ref[...] = jnp.zeros_like(acc_ref) + bias_ref[...]

    acc_ref[...] += lax.dot_general(
        x_ref[...], w_ref[...], dimension_numbers=(((1,), (1,)), ((), ())),
        preferred_element_type=jnp.float32)

    @pl.when(k == pl.num_programs(3) - 1)
    def _():
        lora = jnp.dot(xa_ref[...], b3_ref[...], preferred_element_type=jnp.float32)
        o_ref[...] = (acc_ref[...] + lora).astype(o_ref.dtype)


# --------------------------------- wrapper ---------------------------------- #

def _pick_tile(dim, want, quantum):
    """Largest t <= min(want, dim) with dim % t == 0 and (t % quantum == 0 or t == dim)."""
    want = max(min(want, dim), 1)
    for cand in range(want, 0, -1):
        if dim % cand == 0 and (cand % quantum == 0 or cand == dim):
            return cand
    return dim


def skilled_lora_forward(x, task_ids, skills, weight, bias, wa_flat, wb_flat, r,
                         *, ts=512, tn=512, tk=1024, compute_dtype=jnp.bfloat16,
                         force_k_split=None):
    B, S, Din = x.shape
    Dout = weight.shape[0]
    T = task_ids.shape[0]
    assert B % T == 0
    repeats = B // T
    if repeats > 1:
        # torch.repeat_interleave(task_ids, repeats, dim=0)
        task_ids = jnp.repeat(task_ids, repeats, axis=0)

    compute_dtype = jnp.dtype(compute_dtype)
    scaling = 1.0 / r

    # ---- skill mixing + LoRA first matmul in plain JAX (tiny work; XLA fuses it,
    #      and hoisting x@A here means the kernel never recomputes it per Dout tile). ----
    # TODO(synk): is_learned=True branch (RelaxedBernoulli.rsample / sigmoid of learned
    # logits) not implemented; this is the deterministic `skills`-buffer constructor path.
    logits = skills[task_ids].astype(jnp.float32)                    # (B, n_skills)
    p = logits / (jnp.sum(logits, axis=-1, keepdims=True) + EPS)
    xf = x.astype(jnp.float32)
    A3 = jnp.dot(p, wa_flat.astype(jnp.float32)).reshape(B, Din, r)  # (B, Din, r) f32
    XA = jnp.einsum("bsd,bdr->bsr", xf, A3)                          # (B, S, r) f32
    # Fold 1/r into B_b; keep f32 so the tiny per-tile epilogue contraction is exact.
    B3 = (jnp.dot(p, wb_flat.astype(jnp.float32)) * scaling).reshape(B, r, Dout)

    xc = x.astype(compute_dtype)
    wc = weight.astype(compute_dtype)                                # (Dout, Din)
    if bias is None:
        bias = jnp.zeros((Dout,), jnp.float32)
    bias2 = bias.astype(jnp.float32).reshape(1, Dout)

    # ---- tile selection (lane dims quantized to 128, sublane dims to 8). ----
    ts = _pick_tile(S, ts, 8)
    tn = _pick_tile(Dout, tn, 128)
    ns, nj = S // ts, Dout // tn

    csize = compute_dtype.itemsize
    osize = jnp.dtype(x.dtype).itemsize

    # ---- generation-aware VMEM budget (v5e/v6e: 128 MiB, v7x: 64 MiB). ----
    try:
        vmem_cap = pltpu.get_tpu_info().vmem_capacity_bytes
    except Exception:
        vmem_cap = 64 << 20                                          # conservative (v7x)
    vmem_budget = int(0.55 * vmem_cap)

    def _need(bts, btn, btk, with_acc):
        in_blk = (bts * btk + btn * btk) * csize + (bts * r + r * btn + btn) * 4
        out_blk = bts * btn * osize
        scratch = bts * btn * 4 if with_acc else 0
        return 2 * in_blk + 2 * out_blk + scratch                    # double-buffered i/o

    fullk_need = _need(ts, tn, Din, False)
    use_k_split = fullk_need > vmem_budget if force_k_split is None else force_k_split

    if not use_k_split:
        # Grid (B, j, si): the weight slab's block index is constant across si, so it is
        # DMA'd once per (b, j) (Pallas skips re-DMA on an unchanged block index).
        # B and j are "parallel" (megacore on v7x); si "arbitrary" keeps the slab resident.
        grid = (B, nj, ns)
        in_specs = [
            pl.BlockSpec((pl.Squeezed(), ts, Din), lambda b, j, si: (b, si, 0)),
            pl.BlockSpec((tn, Din), lambda b, j, si: (j, 0)),
            pl.BlockSpec((pl.Squeezed(), ts, r), lambda b, j, si: (b, si, 0)),
            pl.BlockSpec((pl.Squeezed(), r, tn), lambda b, j, si: (b, 0, j)),
            pl.BlockSpec((1, tn), lambda b, j, si: (0, j)),
        ]
        out_specs = pl.BlockSpec((pl.Squeezed(), ts, tn), lambda b, j, si: (b, si, j))
        scratch_shapes = []
        kernel = lora_kernel_fullk
        dim_sem = ("parallel", "parallel", "arbitrary")
        need = fullk_need
        bytes_accessed = int(B * nj * S * Din * csize + B * Dout * Din * csize
                             + B * nj * S * r * 4 + B * r * Dout * 4
                             + bias2.nbytes + B * S * Dout * osize)
    else:
        tk = _pick_tile(Din, tk, 128)
        # Trace-time shrink until the double-buffered working set fits the budget.
        for _ in range(8):
            if _need(ts, tn, tk, True) <= vmem_budget:
                break
            if tk > 128:
                tk = _pick_tile(Din, max(tk // 2, 128), 128)
            elif tn > 128:
                tn = _pick_tile(Dout, max(tn // 2, 128), 128)
            elif ts > 8:
                ts = _pick_tile(S, max(ts // 2, 8), 8)
            else:
                break
        ns, nj, nk = S // ts, Dout // tn, Din // tk
        grid = (B, ns, nj, nk)
        in_specs = [
            pl.BlockSpec((pl.Squeezed(), ts, tk), lambda b, si, j, k: (b, si, k)),
            pl.BlockSpec((tn, tk), lambda b, si, j, k: (j, k)),
            pl.BlockSpec((pl.Squeezed(), ts, r), lambda b, si, j, k: (b, si, 0)),
            pl.BlockSpec((pl.Squeezed(), r, tn), lambda b, si, j, k: (b, 0, j)),
            pl.BlockSpec((1, tn), lambda b, si, j, k: (0, j)),
        ]
        out_specs = pl.BlockSpec((pl.Squeezed(), ts, tn),
                                 lambda b, si, j, k: (b, si, j))
        scratch_shapes = [pltpu.VMEM((ts, tn), jnp.float32)]
        kernel = lora_kernel_ksplit
        dim_sem = ("parallel", "parallel", "parallel", "arbitrary")
        need = _need(ts, tn, tk, True)
        bytes_accessed = int(B * nj * S * Din * csize + B * ns * Dout * Din * csize
                             + B * S * r * 4 + B * ns * r * Dout * 4
                             + bias2.nbytes + B * S * Dout * osize)

    vmem_limit = int(min(max(need * 5 // 4, 16 << 20), vmem_budget))
    flops = int(2 * B * S * Din * Dout + 2 * B * S * r * Dout)

    out = pl.pallas_call(
        kernel,
        out_shape=jax.ShapeDtypeStruct((B, S, Dout), x.dtype),
        grid=grid,
        in_specs=in_specs,
        out_specs=out_specs,
        scratch_shapes=scratch_shapes,
        compiler_params=pltpu.CompilerParams(
            dimension_semantics=dim_sem, vmem_limit_bytes=vmem_limit),
        cost_estimate=pl.CostEstimate(flops=flops, transcendentals=0,
                                      bytes_accessed=bytes_accessed),
    )(xc, wc, XA, B3, bias2)
    return out


# ---------------------------- pure-JAX reference ----------------------------- #

def ref_forward(x, task_ids, skills, weight, bias, wa_flat, wb_flat, r):
    B, S, Din = x.shape
    Dout = weight.shape[0]
    T = task_ids.shape[0]
    repeats = B // T
    if repeats > 1:
        task_ids = jnp.repeat(task_ids, repeats, axis=0)
    lg = skills[task_ids]
    p = lg / (lg.sum(-1, keepdims=True) + EPS)
    A = (p @ wa_flat).reshape(B, Din, r)
    Bm = (p @ wb_flat).reshape(B, r, Dout)
    lora = jnp.einsum("bsd,bdr->bsr", x, A)
    lora = jnp.einsum("bsr,bro->bso", lora, Bm)
    base = x @ weight.T + bias[None, None, :]
    return base + lora * (1.0 / r)


# ----------------------------------- main ------------------------------------ #

if __name__ == "__main__":
    # Small but lane-dense shapes so both variants and the Dout/Din/S tilings are
    # actually exercised.
    B, S = 4, 128               # batch, sequence
    Din, Dout = 256, 256        # in_features, out_features
    r = 16                      # LoRA rank (module default)
    n_tasks, n_skills = 3, 4
    T = 2                       # len(task_ids); B % T == 0 -> repeats = 2

    key = jax.random.PRNGKey(0)
    kx, kw, kb, ks, ka, kb2 = jax.random.split(key, 6)

    x = jax.random.normal(kx, (B, S, Din), dtype=jnp.float32)
    weight = jax.random.normal(kw, (Dout, Din), dtype=jnp.float32) * 0.05
    bias = jax.random.normal(kb, (Dout,), dtype=jnp.float32) * 0.05
    skills = jax.random.uniform(ks, (n_tasks, n_skills), dtype=jnp.float32,
                                minval=0.1, maxval=1.0)
    task_ids = jnp.array([0, 2], dtype=jnp.int32)

    # reset_parameters(): A ~ U(-std, std), std = gain('leaky_relu', sqrt(5)) / sqrt(in)
    gain = math.sqrt(2.0 / (1.0 + 5.0))
    std = gain / math.sqrt(Din)
    wa_flat = jax.random.uniform(ka, (n_skills, r * Din), dtype=jnp.float32,
                                 minval=-std, maxval=std)
    # Module zero-inits skills_weight_B; use small random values so the LoRA path is
    # non-trivially exercised.
    wb_flat = jax.random.uniform(kb2, (n_skills, Dout * r), dtype=jnp.float32,
                                 minval=-std, maxval=std)

    ref = ref_forward(x, task_ids, skills, weight, bias, wa_flat, wb_flat, r)

    # 1) f32 operands, full-Din (no k axis) variant; grid (4, 2, 2) exercises j & si.
    out = skilled_lora_forward(x, task_ids, skills, weight, bias, wa_flat, wb_flat, r,
                               ts=64, tn=128, compute_dtype=jnp.float32,
                               force_k_split=False)
    out = jax.block_until_ready(out)
    np.testing.assert_allclose(np.asarray(out), np.asarray(ref), rtol=1e-4, atol=1e-4)

    # 2) f32 operands, k-split (Din-tiled, resident f32 accumulator) variant; grid (4,1,2,2).
    out_ks = skilled_lora_forward(x, task_ids, skills, weight, bias, wa_flat, wb_flat, r,
                                  ts=128, tn=128, tk=128, compute_dtype=jnp.float32,
                                  force_k_split=True)
    out_ks = jax.block_until_ready(out_ks)
    np.testing.assert_allclose(np.asarray(out_ks), np.asarray(ref), rtol=1e-4, atol=1e-4)

    # 3) default production path: bf16 MXU operands, f32 accumulation, auto variant/tiles.
    out_bf16 = skilled_lora_forward(x, task_ids, skills, weight, bias,
                                    wa_flat, wb_flat, r)
    out_bf16 = jax.block_until_ready(out_bf16)
    np.testing.assert_allclose(np.asarray(out_bf16), np.asarray(ref),
                               rtol=5e-2, atol=5e-2)

    print("KERNEL_OK")
</pallas_src>

<mosaic_0001>
module attributes {stable_mosaic.version = 11 : i64} {
  func.func @lora_kernel_fullk(%arg0: i32, %arg1: i32, %arg2: i32, %arg3: memref<1x64x256xf32, #tpu.memory_space<vmem>>, %arg4: memref<128x256xf32, #tpu.memory_space<vmem>>, %arg5: memref<1x64x16xf32, #tpu.memory_space<vmem>>, %arg6: memref<1x16x128xf32, #tpu.memory_space<vmem>>, %arg7: memref<1x128xf32, #tpu.memory_space<vmem>>, %arg8: memref<1x64x128xf32, #tpu.memory_space<vmem>>) attributes {dimension_semantics = [#tpu.dimension_semantics<parallel>, #tpu.dimension_semantics<parallel>, #tpu.dimension_semantics<arbitrary>], iteration_bounds = array<i64: 4, 2, 2>, scalar_prefetch = 0 : i64, scratch_operands = 0 : i64, tpu.core_type = #tpu.core_type<tc>, window_params = [{transform_indices = @transform_0, window_bounds = array<i64: 1, 64, 256>}, {transform_indices = @transform_1, window_bounds = array<i64: 128, 256>}, {transform_indices = @transform_2, window_bounds = array<i64: 1, 64, 16>}, {transform_indices = @transform_3, window_bounds = array<i64: 1, 16, 128>}, {transform_indices = @transform_4, window_bounds = array<i64: 1, 128>}, {transform_indices = @transform_5, window_bounds = array<i64: 1, 64, 128>}]} {
    %c0 = arith.constant 0 : index
    %c0_0 = arith.constant 0 : index
    %c0_1 = arith.constant 0 : index
    %0 = vector.load %arg3[%c0, %c0_0, %c0_1] : memref<1x64x256xf32, #tpu.memory_space<vmem>>, vector<1x64x256xf32>
    %1 = vector.shape_cast %0 : vector<1x64x256xf32> to vector<64x256xf32>
    %c0_2 = arith.constant 0 : index
    %c0_3 = arith.constant 0 : index
    %2 = vector.load %arg4[%c0_2, %c0_3] : memref<128x256xf32, #tpu.memory_space<vmem>>, vector<128x256xf32>
    %cst = arith.constant dense<0.000000e+00> : vector<64x128xf32>
    %3 = tpu.matmul %1, %2, %cst {dimension_numbers = #tpu.dot_dimension_numbers<[1], [1], [0], [0], [0, 0, 1, 0], [], []>} : vector<64x256xf32>, vector<128x256xf32>, vector<64x128xf32> -> vector<64x128xf32>
    %c0_4 = arith.constant 0 : index
    %c0_5 = arith.constant 0 : index
    %c0_6 = arith.constant 0 : index
    %4 = vector.load %arg5[%c0_4, %c0_5, %c0_6] : memref<1x64x16xf32, #tpu.memory_space<vmem>>, vector<1x64x16xf32>
    %5 = vector.shape_cast %4 : vector<1x64x16xf32> to vector<64x16xf32>
    %c0_7 = arith.constant 0 : index
    %c0_8 = arith.constant 0 : index
    %c0_9 = arith.constant 0 : index
    %6 = vector.load %arg6[%c0_7, %c0_8, %c0_9] : memref<1x16x128xf32, #tpu.memory_space<vmem>>, vector<1x16x128xf32>
    %7 = vector.shape_cast %6 : vector<1x16x128xf32> to vector<16x128xf32>
    %cst_10 = arith.constant dense<0.000000e+00> : vector<64x128xf32>
    %8 = tpu.matmul %5, %7, %cst_10 {dimension_numbers = #tpu.dot_dimension_numbers<[1], [0], [0], [1], [0, 0, 1, 1], [], []>} : vector<64x16xf32>, vector<16x128xf32>, vector<64x128xf32> -> vector<64x128xf32>
    %c0_11 = arith.constant 0 : index
    %c0_12 = arith.constant 0 : index
    %9 = vector.load %arg7[%c0_11, %c0_12] : memref<1x128xf32, #tpu.memory_space<vmem>>, vector<1x128xf32>
    %10 = vector.broadcast %9 : vector<1x128xf32> to vector<64x128xf32>
    %11 = arith.addf %3, %10 : vector<64x128xf32>
    %12 = arith.addf %11, %8 : vector<64x128xf32>
    %c0_13 = arith.constant 0 : index
    %c0_14 = arith.constant 0 : index
    %c0_15 = arith.constant 0 : index
    %13 = vector.load %arg8[%c0_13, %c0_14, %c0_15] : memref<1x64x128xf32, #tpu.memory_space<vmem>>, vector<1x64x128xf32>
    %14 = vector.shape_cast %13 : vector<1x64x128xf32> to vector<64x128xf32>
    %15 = vector.shape_cast %12 : vector<64x128xf32> to vector<1x64x128xf32>
    tpu.vector_store %arg8[%c0_13, %c0_14, %c0_15], %15 {strides = array<i32>} : memref<1x64x128xf32, #tpu.memory_space<vmem>>, vector<1x64x128xf32>,
    return
  }
  func.func @transform_0(%arg0: i32, %arg1: i32, %arg2: i32) -> (i32, i32, i32) {
    %c0_i32 = arith.constant 0 : i32
    %c0_i32_0 = arith.constant 0 : i32
    return %arg0, %arg2, %c0_i32 : i32, i32, i32
  }
  func.func @transform_1(%arg0: i32, %arg1: i32, %arg2: i32) -> (i32, i32) {
    %c0_i32 = arith.constant 0 : i32
    %c0_i32_0 = arith.constant 0 : i32
    return %arg1, %c0_i32 : i32, i32
  }
  func.func @transform_2(%arg0: i32, %arg1: i32, %arg2: i32) -> (i32, i32, i32) {
    %c0_i32 = arith.constant 0 : i32
    %c0_i32_0 = arith.constant 0 : i32
    return %arg0, %arg2, %c0_i32 : i32, i32, i32
  }
  func.func @transform_3(%arg0: i32, %arg1: i32, %arg2: i32) -> (i32, i32, i32) {
    %c0_i32 = arith.constant 0 : i32
    %c0_i32_0 = arith.constant 0 : i32
    return %arg0, %c0_i32, %arg1 : i32, i32, i32
  }
  func.func @transform_4(%arg0: i32, %arg1: i32, %arg2: i32) -> (i32, i32) {
    %c0_i32 = arith.constant 0 : i32
    %c0_i32_0 = arith.constant 0 : i32
    return %c0_i32, %arg1 : i32, i32
  }
  func.func @transform_5(%arg0: i32, %arg1: i32, %arg2: i32) -> (i32, i32, i32) {
    %c0_i32 = arith.constant 0 : i32
    return %arg0, %arg2, %arg1 : i32, i32, i32
  }
}

</mosaic_0001>

<bundles_post_ra>
// kernel: tpu_custom_call.1
= control target key start
LH: loop header
LB: loop body
LE: loop exit
PB: predicated region body
PF: predicated region fallthrough
CT: control target
= control target key end

     0   :  { %s1893_s0 = inlined_call_operand.hbm [shape: f32[4,128,256], index: 0, kind: input, shape index: {}]   ;;  %s1894_s1 = inlined_call_operand.vmem [shape: f32[256,256], index: 1, kind: input, shape index: {}]   ;;  %s1895_s2 = inlined_call_operand.vmem [shape: f32[4,128,16], index: 2, kind: input, shape index: {}]   ;;  %s1896_s3 = inlined_call_operand.hbm [shape: f32[4,16,256], index: 3, kind: input, shape index: {}]   ;;  %s1897_s4 = inlined_call_operand.vmem [shape: f32[1,256], index: 4, kind: input, shape index: {}]   ;;  %s1898_s5 = inlined_call_operand.hbm [shape: f32[4,128,256], index: 5, kind: output, shape index: {}]  }
   0x1   :  { %1917 = sst [smem:[#allocation20_spill]] %s1894_s1 }
   0x2   :  { %1918 = sst [smem:[#allocation21_spill]] %s1895_s2 }
   0x3   :  { %1919 = sst [smem:[#allocation22_spill]] %s1897_s4 }
   0x4   :  { %1920 = sst [smem:[#allocation23_spill]] %s1898_s5 }
   0x5   :  { %10 = vsyncpa [#allocation3], 0 }
   0x6   :  { %12 = vsyncpa [#allocation3 + $0x1], 0 }
   0x7   :  { %13 = vsyncpa [#allocation6], 0 }
   0x8   :  { %15 = vsyncpa [#allocation6 + $0x1], 0 }
   0x9   :  { %16 = vsyncpa [#allocation4], 0 }
   0xa   :  { %18 = vsyncpa [#allocation4 + $0x1], 0  ;;  %s1427_s18 = smov 0   ;;  %s1429_s19 = smov 0  }
   0xb   :  { %s1431_s20 = smov 0   ;;  %s1433_s21 = smov 0  }
   0xc   :  { %s1435_s22 = smov 0   ;;  %s1437_s23 = smov 0  }
   0xd   :  { %s1439_s24 = smov 0   ;;  %s1441_s25 = smov 0  }
   0xe   :  { %s1443_s26 = smov 0   ;;  %s1445_s27 = smov 0  }
   0xf   :  { %s1447_s28 = smov 0   ;;  %s1449_s29 = smov 0  }
  0x10   :  { %s1451_s30 = smov 0   ;;  %s1453_s6 = smov 0  }
  0x11   :  { %s1455_s7 = smov 0   ;;  %s1457_s8 = smov 0  }
  0x12 LB: > { %1921 = sst [smem:[#allocation11_spill]] %s1325_s18  ;;  %s886_s9 = sadd.s32 4294967295, %s1385_s8   ;;  %s1385_s8 = sphi %s1457_s8, %s24_s8   ;;  %s1381_s7 = sphi %s1455_s7, %s1977_s7   ;;  %s1377_s6 = sphi %s1453_s6, %s1976_s6   ;;  %s1373_s30 = sphi %s1451_s30, %s1975_s30   ;;  %s1369_s29 = sphi %s1449_s29, %s1974_s29   ;;  %s1365_s28 = sphi %s1447_s28, %s1973_s28   ;;  %s1361_s27 = sphi %s1445_s27, %s1972_s27   ;;  %s1357_s26 = sphi %s1443_s26, %s1971_s26   ;;  %s1353_s25 = sphi %s1441_s25, %s1970_s25   ;;  %s1349_s24 = sphi %s1439_s24, %s1969_s24   ;;  %s1345_s23 = sphi %s1437_s23, %s1968_s23   ;;  %s1341_s22 = sphi %s1435_s22, %s1967_s22   ;;  %s1337_s21 = sphi %s1433_s21, %s1966_s21   ;;  %s1333_s20 = sphi %s1431_s20, %s1965_s20   ;;  %s1329_s19 = sphi %s1429_s19, %s1964_s19   ;;  %s1325_s18 = sphi %s1427_s18, %s1959_s18  }
  0x13   : > { %1922 = sst [smem:[#allocation12_spill]] %s1329_s19  ;;  %s887_s10 = sadd.s32 4294967294, %s1385_s8  }
  0x14   : > { %1923 = sst [smem:[#allocation13_spill]] %s1361_s27  ;;  %s36_s11 = sadd.s32 1, %s1373_s30 }
  0x15   : > { %1924 = sst [smem:[#allocation14_spill]] %s1365_s28  ;;  %s39_s12 = sadd.s32 1, %s1377_s6 }
  0x16   : > { %1925 = sst [smem:[#allocation15_spill]] %s1369_s29  ;;  %p37_p0 = scmp.ge.s32.totalorder %s36_s11, 2 }
  0x17   : > { %s43_s13 = sadd.s32 1, %s1381_s7  ;;  %p59_p1 = scmp.ne.s32.totalorder %s1357_s26, %s1353_s25 }
  0x18   : > { %s1979_s11 = smov (%p37_p0, %s36_s11), 0  ;;  %s1981_s12 = smov (!%p37_p0, %s39_s12), %s1377_s6 }
  0x19   : > { %1926 = sst [smem:[#allocation16_spill]] %s1979_s11  ;;  %s48_s15 = ssub.s32 %s1373_s30, %s1979_s11 }
  0x1a   : > { %p1912_p2 = scmp.eq.s32.totalorder %s1385_s8, 0  ;;  %p41_p3 = scmp.ge.s32.totalorder %s1981_s12, 2 }
  0x1b   : > { %p65_p4 = scmp.ne.s32.totalorder %s1353_s25, %s1349_s24  ;;  %p1526_p6 = scmp.eq.s32.totalorder %s886_s9, 0 }
  0x1c   : > { %p1522_p5 = por %p1912_p2, %p59_p1  ;;  %s1983_s12 = smov (%p41_p3, %s1981_s12), 0 }
  0x1d   : > { %s1928_s17 = scalar_select %p1526_p6, 1, 0 }
  0x1e   : > { %1929 = sst [smem:[#allocation17_spill]] %s1983_s12  ;;  %s1985_s13 = smov (!%p41_p3, %s43_s13), %s1381_s7 }
  0x1f   : > { %p1535_p7 = por %p1526_p6, %p65_p4  ;;  %s130_s24 = ssub.s32 %s1377_s6, %s1983_s12 }
  0x20   : > { %p45_p8 = scmp.ge.s32.totalorder %s1985_s13, 4  ;;  %s190_s11 = sadd.s32 1, %s1333_s20 }
  0x21   : > { %s1930_s14 = scalar_select %p1535_p7, 1, 0 }
  0x22   : > { %p200_p9 = scmp.ne.s32.totalorder %s1333_s20, %s1329_s19  ;;  %p201_p10 = scmp.eq.s32.totalorder %s886_s9, 15 }
  0x23   : > { %s1987_s13 = smov (%p45_p8, %s1985_s13), 0  ;;  %p206_p12 = scmp.ne.s32.totalorder %s1329_s19, %s1325_s18 }
  0x24   : > { %1931 = sst [smem:[#allocation18_spill]] %s1987_s13  ;;  %p1546_p11 = por %p201_p10, %p200_p9 }
  0x25   : > { %s47_s12 = ssub.s32 %s1381_s7, %s1987_s13  ;;  %p207_p13 = scmp.eq.s32.totalorder %s887_s10, 15 }
  0x26   : > { %s1932_s5 = scalar_select %p1546_p11, 1, 0 }
  0x27   : > { %s49_s4 = sor.u32 %s48_s15, %s47_s12  ;;  %s131_s2 = sor.u32 %s130_s24, %s47_s12 }
  0x28   : > { %1933 = sst [smem:[#allocation19_spill]] %s1932_s5  ;;  %p50_p0 = scmp.eq.s32.totalorder %s49_s4, 0 }
  0x29   : > { %p1554_p1 = scmp.eq.s32.totalorder %s131_s2, 0  ;;  %s187_s9 = sor.u32 %s130_s24, %s49_s4 }
  0x2a   : > { %p1558_p3 = por %p207_p13, %p206_p12  ;;  %s1936_s5 = sadd.s32 1, %s1357_s26 }
  0x2b   : > { %s1565_s27 = scalar_select %p50_p0, %s1357_s26, %s1936_s5  }
  0x2c   : > { %s1935_s29 = scalar_select %p1558_p3, 1, 0 }
  0x2d   : > { %p188_p4 = scmp.eq.s32.totalorder %s187_s9, 0  ;;  %p1911_p8 = scmp.lt.s32.totalorder %s1385_s8, 16 }
  0x2e   : > { %s227_s10 = sand.u32 1, %s1357_s26   ;;  %s924_s2 = sshll.u32 %s1373_s30, 4 }
  0x2f   : > { %s1570_s15 = scalar_select %p188_p4, %s1333_s20, %s190_s11  }
  0x30   : > { %s890_s12 = sshll.u32 %s227_s10, 7  ;;  %s893_s13 = sshll.u32 %s1381_s7, 5 }
  0x31   : > { %s231_s18 = scalar_lea.vmem [#allocation2], %s890_s12  ;;  %s238_s28 = sadd.s32 %s924_s2, %s893_s13 }
  0x32   : > { %s241_s19 = sshll.u32 %s231_s18, 4  ;;  %s894_s4 = sshll.u32 %s238_s28, 7  ;;  %s1574_s19 = int_to_ptr.vmem [resolvable:$true] %s241_s19 }
  0x33   : > { %p1580_p9 = pnand %p1911_p8, %p1522_p5  ;;  %s1587_s11 = scalar_lea.hbm %s1893_s0, %s894_s4 }
  0x34   : > { %s1589_s18 = scalar_lea.sflag [#allocation3], %s227_s10  ;;  %s1159_s28 = scalar_lea.hbm %s1587_s11, 2048 }
  0x35   : > { %p1160_p10 = scmp.ne.s32.totalorder %s1587_s11, %s1159_s28  ;;  %p1161_p5 = pneg %p1580_p9 }
  0x36   : > { %s1164_s12 = scalar_lea.hbm %s1893_s0, 16384  ;;  %p1165_p0 = scmp.lt.u32.totalorder %s1587_s11, %s1893_s0 }
  0x37   : > { %p1162_p12 = pnand %p1161_p5, %p1160_p10  ;;  %p1166_p4 = scmp.lt.u32.totalorder %s1164_s12, %s1159_s28 }
  0x38   : > { %p1168_p2 = scmp.lt.u32.totalorder %s1159_s28, %s1587_s11 }
  0x39   : > { %p1163_p13 = pneg %p1162_p12  ;;  %p1167_p8 = por %p1166_p4, %p1165_p0 }
  0x3b   : > { %p1169_p3 = por %p1168_p2, %p1167_p8 }
  0x3d   : > { %p1170_p11 = pnand %p1169_p3, %p1163_p13 }
  0x3f   : > { %1173 = shalt.err (!%p1170_p11)
}
  0x40   : > { %s1174_s10 = scalar_lea.vmem %s1574_s19, 2048  ;;  %s1387_s5 = smov [#allocation2]  }
  0x41   : > { %p1175_p10 = scmp.ne.s32.totalorder %s1574_s19, %s1174_s10  ;;  %s1179_s9 = sshll.u32 %s1387_s5, 4  ;;  %s1180_s9 = int_to_ptr.vmem [resolvable:$false] %s1179_s9 }
  0x42   : > { %s1181_s13 = scalar_lea.vmem %s1180_s9, 4096  ;;  %p1182_p6 = scmp.lt.s32.totalorder %s1574_s19, %s1180_s9 }
  0x43   : > { %p1177_p12 = pnand %p1175_p10, %p1161_p5  ;;  %p1183_p0 = scmp.lt.s32.totalorder %s1181_s13, %s1174_s10 }
  0x45   : > { %p1178_p7 = pneg %p1177_p12  ;;  %p1184_p4 = por %p1183_p0, %p1182_p6 }
  0x47   : > { %p1185_p2 = pnand %p1184_p4, %p1178_p7 }
  0x49   : > { %1188 = shalt.err (!%p1185_p2)
}
  0x4a   : > { %s1388_s28 = smov 256   ;;  %s1389_s16 = smov 16  }
  0x4b   : > { %1014 = dma.hbm_to_vmem [thread:$0]  (!%p1580_p9), %s1587_s11, 2048, %s1574_s19, %s1589_s18, %s1388_s28, %s1388_s28, %s1389_s16  }
  0x4c   : > { %p898_p6 = scmp.ge.s32.totalorder %s1385_s8, 1  ;;  %p300_p7 = scmp.lt.s32.totalorder %s1385_s8, 17 }
  0x4d   : > { %s134_s2 = sadd.s32 1, %s1345_s23  ;;  %p141_p3 = scmp.ne.s32.totalorder %s1345_s23, %s1341_s22 }
  0x4e   : > { %p1621_p11 = pnand %p898_p6, %p300_p7  ;;  %p147_p8 = scmp.ne.s32.totalorder %s1341_s22, %s1337_s21 }
  0x4f   : > { %s1629_s4 = scalar_select %p1554_p1, %s1345_s23, %s134_s2  }
  0x50   : > { %s274_s10 = sand.u32 1, %s1345_s23   ;;  %s896_s5 = sshll.u32 %s1381_s7, 2 }
  0x51   : > { %p1939_p5 = scmp.eq.s32.totalorder %s1385_s8, 0  ;;  %p1940_p10 = scmp.ne.s32.totalorder %s1928_s17, 0 }
  0x52   : > { %s895_s24 = sshll.u32 %s274_s10, 4  ;;  %s283_s11 = sadd.s32 %s1377_s6, %s896_s5 }
  0x53   : > { %p143_p13 = por %p141_p3, %p1939_p5  ;;  %p1641_p12 = por %p147_p8, %p1940_p10 }
  0x54   : > { %s897_s18 = sshll.u32 %s283_s11, 7  ;;  %s278_s9 = scalar_lea.vmem [#allocation5], %s895_s24 }
  0x55   : > { %s1941_s19 = scalar_select %p1641_p12, 1, 0 }
  0x56   : > { %s286_s13 = sshll.u32 %s278_s9, 4  ;;  %s1649_s2 = scalar_lea.hbm %s1896_s3, %s897_s18  ;;  %s1651_s13 = int_to_ptr.vmem [resolvable:$true] %s286_s13 }
  0x57   : > { %p1942_p1 = scmp.lt.s32.totalorder %s1385_s8, 16  ;;  %s1659_s17 = scalar_lea.sflag [#allocation6], %s274_s10 }
  0x58   : > { %s1189_s5 = scalar_lea.hbm %s1649_s2, 256  ;;  %s1194_s18 = scalar_lea.hbm %s1896_s3, 2048 }
  0x59   : > { %p1655_p9 = pnand %p1942_p1, %p143_p13  ;;  %p1190_p0 = scmp.ne.s32.totalorder %s1649_s2, %s1189_s5 }
  0x5a   : > { %p1195_p7 = scmp.lt.u32.totalorder %s1649_s2, %s1896_s3  ;;  %p1196_p3 = scmp.lt.u32.totalorder %s1194_s18, %s1189_s5 }
  0x5b   : > { %p1191_p4 = pneg %p1655_p9  ;;  %p1198_p5 = scmp.lt.u32.totalorder %s1189_s5, %s1649_s2 }
  0x5c   : > { %p1197_p8 = por %p1196_p3, %p1195_p7 }
  0x5d   : > { %p1192_p2 = pnand %p1191_p4, %p1190_p0 }
  0x5e   : > { %p1199_p13 = por %p1198_p5, %p1197_p8 }
  0x5f   : > { %p1193_p6 = pneg %p1192_p2 }
  0x61   : > { %p1200_p10 = pnand %p1199_p13, %p1193_p6 }
  0x63   : > { %1203 = shalt.err (!%p1200_p10)
}
  0x64   : > { %s1204_s10 = scalar_lea.vmem %s1651_s13, 256  ;;  %s1390_s1 = smov [#allocation5]  }
  0x65   : > { %p1205_p1 = scmp.ne.s32.totalorder %s1651_s13, %s1204_s10  ;;  %s1209_s24 = sshll.u32 %s1390_s1, 4  ;;  %s1210_s24 = int_to_ptr.vmem [resolvable:$false] %s1209_s24 }
  0x66   : > { %s1211_s11 = scalar_lea.vmem %s1210_s24, 512  ;;  %p1212_p12 = scmp.lt.s32.totalorder %s1651_s13, %s1210_s24 }
  0x67   : > { %p1207_p0 = pnand %p1205_p1, %p1191_p4  ;;  %p1213_p7 = scmp.lt.s32.totalorder %s1211_s11, %s1204_s10 }
  0x69   : > { %p1208_p2 = pneg %p1207_p0  ;;  %p1214_p3 = por %p1213_p7, %p1212_p12 }
  0x6b   : > { %p1215_p8 = pnand %p1214_p3, %p1208_p2 }
  0x6d   : > { %1218 = shalt.err (!%p1215_p8)
}
  0x6e   : > { %s1391_s5 = smov 128   ;;  %s1392_s18 = smov 8  }
  0x6f   : > { %1017 = dma.hbm_to_vmem [thread:$0]  (!%p1655_p9), %s1649_s2, 256, %s1651_s13, %s1659_s17, %s1388_s28, %s1391_s5, %s1392_s18  }
  0x70   : > { %304 = sbr.rel (%p1621_p11) target bundleno = 452 (0x1c4), region = 40  ;;  %s306_s9 = sand.u32 (!%p1621_p11), 1, %s1353_s25  }
  0x71   : > { %s899_s16 = sshll.u32 (!%p1621_p11), %s306_s9, 7  ;;  %s307_s10 = scalar_lea.sflag (!%p1621_p11), [#allocation3], %s306_s9 }
  0x72   : > { %s1691_s1 = scalar_lea.vmem (!%p1621_p11), [#allocation2], %s899_s16  ;;  %p1944_p12 = scmp.ne.s32.totalorder (!%p1621_p11), %s1930_s14, 0 }
  0x77   : > { %1312 = dma.done.wait (%p1944_p12), %s307_s10, 2048  }
  0x78   : > { %1314 = vsyncadd (%p1944_p12), %s307_s10, 4294965248  ;;  %s315_s21 = sand.u32 1, %s1341_s22   ;;  %p1945_p9 = scmp.ne.s32.totalorder %s1941_s19, 0 }
  0x79   : > { %s900_s24 = sshll.u32 %s315_s21, 4  ;;  %s316_s28 = scalar_lea.sflag [#allocation6], %s315_s21 }
  0x7a   : > { %s319_s13 = scalar_lea.vmem [#allocation5], %s900_s24 }
  0x7b   : > { %1316 = dma.done.wait (%p1945_p9), %s316_s28, 256  }
  0x7c   : > { %1318 = vsyncadd (%p1945_p9), %s316_s28, 4294967040  ;;  %s1946_s12 = sld [smem:[#allocation14_spill]]  ;;  %s1947_s2 = sld [smem:[#allocation13_spill]]  ;;  %v447_v0 = vld [vmem:[%s319_s13] sm:$0xff]  ;;  %v448_v1 = vld [vmem:[%s319_s13 + $0x8] sm:$0xff]  ;;  %vm449_vm0 = vcmask 130048  }
  0x7d   : > { %s1948_s17 = sld [smem:[#allocation15_spill]]  ;;  %s1949_s10 = sld [smem:[#allocation20_spill]]  ;;  %v953_v3 = vpack.c.bf16 %v448_v1, %v447_v0  ;;  %v398_v22 = vld [vmem:[%s1691_s1 + $0x38] sm:$0xff]  ;;  %v392_v35 = vld [vmem:[%s1691_s1 + $0x8] sm:$0xff]  ;;  %v397_v61 = vld [vmem:[%s1691_s1 + $0x30] sm:$0xff] }
  0x7e   : > { %665 = vmatprep.mubr.f32.mxu1 %v398_v22  ;;  %v400_v62 = vld [vmem:[%s1691_s1 + $0x48] sm:$0xff]  ;;  %v399_v63 = vld [vmem:[%s1691_s1 + $0x40] sm:$0xff]  ;;  %v402_v0 = vld [vmem:[%s1691_s1 + $0x58] sm:$0xff] }
  0x7f   : > { %954 = vmatprep.subr.bf16.mxu0 %v953_v3  ;;  %v401_v1 = vld [vmem:[%s1691_s1 + $0x50] sm:$0xff] }
  0x80   : > { %956 = vmatpush3.bf16.msra.mxu0 %v953_v3  ;;  %v404_v3 = vld [vmem:[%s1691_s1 + $0x68] sm:$0xff] }
  0x82   : > { %s902_s11 = sshll.u32 %s1946_s12, 4  ;;  %s905_s5 = sshll.u32 %s1947_s2, 3 }
  0x83   : > { %p371_p11 = scmp.lt.s32.totalorder %s902_s11, 31  ;;  %p378_p4 = scmp.lt.s32.totalorder %s1948_s17, 3 }
  0x84   : > { %p380_p6 = scmp.lt.s32.totalorder %s905_s5, 15  ;;  %p387_p5 = scmp.lt.s32.totalorder %s1946_s12, 1 }
  0x85   : > { %s1989_s11 = smov (!%p371_p11, %s902_s11), 31  ;;  %s926_s13 = sshll.u32 %s1947_s2, 4 }
  0x86   : > { %s379_s14 = scalar_select %p378_p4, %s1948_s17, 3 }
  0x87   : > { %s925_s18 = sshll.u32 %s1989_s11, 4  ;;  %s1991_s5 = smov (!%p380_p6, %s905_s5), 15 }
  0x88   : > { %s1709_s21 = scalar_lea.vmem %s1949_s10, %s925_s18  ;;  %s906_s19 = sshll.u32 %s379_s14, 4 }
  0x89   : > { %v408_v2 = vld [vmem:[%s1709_s21 + $0x8] sm:$0xff]  ;;  %v410_v4 = vld [vmem:[%s1709_s21 + $0x18] sm:$0xff]  ;;  %v407_v5 = vld [vmem:[%s1709_s21] sm:$0xff]  ;;  %s383_s24 = sadd.s32 %s906_s19, %s1991_s5  ;;  %s1950_s14 = sld [smem:[#allocation21_spill]] }
  0x8a   : > { %v409_v6 = vld [vmem:[%s1709_s21 + $0x10] sm:$0xff]  ;;  %v957_v7 = vpack.c.bf16 %v410_v4, %v408_v2  ;;  %v412_v9 = vld [vmem:[%s1709_s21 + $0x28] sm:$0xff]  ;;  %v414_v10 = vld [vmem:[%s1709_s21 + $0x38] sm:$0xff]  ;;  %s907_s28 = sshll.u32 %s383_s24, 3  ;;  %s1951_s5 = sld [smem:[#allocation12_spill]] }
  0x8b   : > { %v959_v8 = vpack.c.bf16 %v409_v6, %v407_v5  ;;  %v961_v11 = vpack.c.bf16 %v414_v10, %v412_v9  ;;  %v411_v14 = vld [vmem:[%s1709_s21 + $0x20] sm:$0xff]  ;;  %v413_v15 = vld [vmem:[%s1709_s21 + $0x30] sm:$0xff]  ;;  %v416_v16 = vld [vmem:[%s1709_s21 + $0x48] sm:$0xff]  ;;  %s388_s9 = scalar_select %p387_p5, %s1946_s12, 1 }
  0x8c   : > { %989 = vmatprep.subr.bf16.mxu1 %v957_v7  ;;  %958 = vmatprep.subr.bf16.mxu0 %v957_v7  ;;  %v418_v17 = vld [vmem:[%s1709_s21 + $0x58] sm:$0xff]  ;;  %v963_v18 = vpack.c.bf16 %v413_v15, %v411_v14  ;;  %v415_v23 = vld [vmem:[%s1709_s21 + $0x40] sm:$0xff]  ;;  %v417_v24 = vld [vmem:[%s1709_s21 + $0x50] sm:$0xff]  ;;  %s720_s11 = sadd.s32 %s1946_s12, %s926_s13  ;;  %s1954_s10 = sld [smem:[#allocation23_spill]] }
  0x8d   : > { %997 = vmatpush1.bf16.xpose.msra.mxu1 %v959_v8  ;;  %v965_v19 = vpack.c.bf16 %v418_v17, %v416_v16  ;;  %v420_v26 = vld [vmem:[%s1709_s21 + $0x68] sm:$0xff]  ;;  %v422_v27 = vld [vmem:[%s1709_s21 + $0x78] sm:$0xff]  ;;  %v967_v28 = vpack.c.bf16 %v417_v24, %v415_v23  ;;  %v419_v33 = vld [vmem:[%s1709_s21 + $0x60] sm:$0xff]  ;;  %s1393_s13 = smov [#allocation7]  }
  0x8e   : > { %990 = vmatprep.subr.bf16.mxu1 %v961_v11  ;;  %v969_v30 = vpack.c.bf16 %v422_v27, %v420_v26  ;;  %v421_v34 = vld [vmem:[%s1709_s21 + $0x70] sm:$0xff]  ;;  %v424_v36 = vld [vmem:[%s1709_s21 + $0x88] sm:$0xff]  ;;  %v426_v37 = vld [vmem:[%s1709_s21 + $0x98] sm:$0xff] }
  0x8f   : > { %s1720_s18 = scalar_lea.vmem %s1950_s14, %s907_s28  ;;  %v971_v38 = vpack.c.bf16 %v421_v34, %v419_v33  ;;  %v973_v39 = vpack.c.bf16 %v426_v37, %v424_v36  ;;  %v423_v40 = vld [vmem:[%s1709_s21 + $0x80] sm:$0xff]  ;;  %v425_v41 = vld [vmem:[%s1709_s21 + $0x90] sm:$0xff]  ;;  %v428_v42 = vld [vmem:[%s1709_s21 + $0xa8] sm:$0xff]  ;;  %s920_s14 = sshll.u32 %s1948_s17, 5 }
  0x90   : > { %v439_v12 = vld [vmem:[%s1720_s18] sm:$0xff]  ;;  %v440_v13 = vld [vmem:[%s1720_s18 + $0x8] sm:$0xff]  ;;  %v441_v20 = vld [vmem:[%s1720_s18 + $0x10] sm:$0xff]  ;;  %v975_v44 = vpack.c.bf16 %v425_v41, %v423_v40  ;;  %s366_s24 = sand.u32 1, %s1951_s5   ;;  %s722_s2 = sadd.s32 %s920_s14, %s720_s11 }
  0x91   : > { %941 = vmatprep.mubr.msk.f32.mxu0 %vm449_vm0, %v439_v12  ;;  %v442_v21 = vld [vmem:[%s1720_s18 + $0x18] sm:$0xff]  ;;  %v443_v25 = vld [vmem:[%s1720_s18 + $0x20] sm:$0xff]  ;;  %v444_v29 = vld [vmem:[%s1720_s18 + $0x28] sm:$0xff]  ;;  %s921_s12 = sshll.u32 %s722_s2, 7  ;;  %s1953_s17 = sld [smem:[#allocation19_spill]] }
  0x92   : > { %942 = vmatmul.mubr.msk.f32.vlgmr.msra.gmra.mrb[0].mxu0 %vm449_vm0, %v440_v13  ;;  %v445_v31 = vld [vmem:[%s1720_s18 + $0x30] sm:$0xff]  ;;  %v446_v32 = vld [vmem:[%s1720_s18 + $0x38] sm:$0xff]  ;;  %v427_v46 = vld [vmem:[%s1709_s21 + $0xa0] sm:$0xff]  ;;  %s1223_s11 = sshll.u32 %s1393_s13, 4  ;;  %s1224_s11 = int_to_ptr.vmem [resolvable:$false] %s1223_s11 }
  0x93   : > { %960 = vmatpush1.bf16.xpose.msra.mxu0 %v959_v8  ;;  %944 = vmatprep.mubr.msk.f32.mxu0 %vm449_vm0, %v441_v20  ;;  %v430_v43 = vld [vmem:[%s1709_s21 + $0xb8] sm:$0xff]  ;;  %v429_v47 = vld [vmem:[%s1709_s21 + $0xb0] sm:$0xff]  ;;  %v432_v48 = vld [vmem:[%s1709_s21 + $0xc8] sm:$0xff]  ;;  %s1225_s14 = scalar_lea.vmem %s1224_s11, 2048 }
  0x94   : > { %962 = vmatprep.subr.bf16.mxu0 %v961_v11  ;;  %v977_v45 = vpack.c.bf16 %v430_v43, %v428_v42  ;;  %v434_v49 = vld [vmem:[%s1709_s21 + $0xd8] sm:$0xff]  ;;  %v979_v50 = vpack.c.bf16 %v429_v47, %v427_v46  ;;  %v431_v52 = vld [vmem:[%s1709_s21 + $0xc0] sm:$0xff]  ;;  %v433_v53 = vld [vmem:[%s1709_s21 + $0xd0] sm:$0xff] }
  0x95   : > { %998 = vmatpush1.bf16.xpose.msra.mxu1 %v963_v18  ;;  %v981_v51 = vpack.c.bf16 %v434_v49, %v432_v48  ;;  %v436_v54 = vld [vmem:[%s1709_s21 + $0xe8] sm:$0xff]  ;;  %v438_v55 = vld [vmem:[%s1709_s21 + $0xf8] sm:$0xff]  ;;  %v983_v56 = vpack.c.bf16 %v433_v53, %v431_v52  ;;  %v435_v58 = vld [vmem:[%s1709_s21 + $0xe0] sm:$0xff] }
  0x96   : > { %991 = vmatprep.subr.bf16.mxu1 %v965_v19  ;;  %945 = vmatmul.mubr.msk.f32.gmra.mrb[2].mxu0 %vm449_vm0, %v442_v21  ;;  %v985_v57 = vpack.c.bf16 %v438_v55, %v436_v54  ;;  %v437_v59 = vld [vmem:[%s1709_s21 + $0xf0] sm:$0xff]  ;;  %v391_v2 = vld [vmem:[%s1691_s1] sm:$0xff]  ;;  %v394_v4 = vld [vmem:[%s1691_s1 + $0x18] sm:$0xff]  ;;  %s1952_s21 = sld [smem:[#allocation22_spill]] }
  0x97   : > { %947 = vmatprep.mubr.msk.f32.mxu0 %vm449_vm0, %v443_v25  ;;  %v987_v60 = vpack.c.bf16 %v437_v59, %v435_v58  ;;  %v403_v5 = vld [vmem:[%s1691_s1 + $0x60] sm:$0xff]  ;;  %v393_v6 = vld [vmem:[%s1691_s1 + $0x10] sm:$0xff]  ;;  %v406_v7 = vld [vmem:[%s1691_s1 + $0x78] sm:$0xff]  ;;  %p1955_p10 = scmp.ne.s32.totalorder %s1953_s17, 0 }
  0x98   : > { %v396_v8 = vld [vmem:[%s1691_s1 + $0x28] sm:$0xff]  ;;  %v405_v9 = vld [vmem:[%s1691_s1 + $0x70] sm:$0xff]  ;;  %v395_v10 = vld [vmem:[%s1691_s1 + $0x20] sm:$0xff]  ;;  %s901_s1 = sshll.u32 %s366_s24, 6 }
  0x99   : > { %s1788_s28 = scalar_lea.vmem [#allocation7], %s901_s1 }
  0x9a   : > { %948 = vmatmul.mubr.msk.f32.gmra.mrb[4].mxu0 %vm449_vm0, %v444_v29  ;;  %s725_s18 = sshll.u32 %s1788_s28, 4  ;;  %s1798_s18 = int_to_ptr.vmem [resolvable:$true] %s725_s18 }
  0x9b   : > { %964 = vmatpush1.bf16.xpose.msra.mxu0 %v963_v18  ;;  %950 = vmatprep.mubr.msk.f32.mxu0 %vm449_vm0, %v445_v31  ;;  %s1219_s1 = scalar_lea.vmem %s1798_s18, 1024  ;;  %p1226_p2 = scmp.lt.s32.totalorder %s1798_s18, %s1224_s11 }
  0x9c   : > { %966 = vmatprep.subr.bf16.mxu0 %v965_v19  ;;  %s389_s19 = scalar_lea.vmem %s1952_s21, %s388_s9  ;;  %s1805_s21 = scalar_lea.hbm %s1954_s10, %s921_s12 }
  0x9d   : > { %999 = vmatpush1.bf16.xpose.msra.mxu1 %v967_v28  ;;  %v916_v19 = vld [vmem:[%s389_s19] ss:$0 sm:$0xff]  ;;  %s1811_s19 = scalar_lea.sflag [#allocation4], %s366_s24  ;;  %p1220_p13 = scmp.ne.s32.totalorder %s1798_s18, %s1219_s1 }
  0x9e   : > { %992 = vmatprep.subr.bf16.mxu1 %v969_v30  ;;  %951 = vmatmul.mubr.msk.f32.gmra.mrb[6].mxu0 %vm449_vm0, %v446_v32  ;;  %p1227_p7 = scmp.lt.s32.totalorder %s1225_s14, %s1219_s1 }
  0x9f   : > { %650 = vmatprep.mubr.f32.mxu0 %v392_v35  ;;  %p1221_p1 = pnand %p1220_p13, %p1955_p10 }
  0xa0   : > { %p1228_p3 = por %p1227_p7, %p1226_p2 }
  0xa1   : > { %p1222_p0 = pneg %p1221_p1 }
  0xa3   : > { %968 = vmatpush1.bf16.xpose.msra.mxu0 %v967_v28  ;;  %p1229_p8 = pnand %p1228_p3, %p1222_p0 }
  0xa4   : > { %970 = vmatprep.subr.bf16.mxu0 %v969_v30 }
  0xa5   : > { %1000 = vmatpush1.bf16.xpose.msra.mxu1 %v971_v38 }
  0xa6   : > { %993 = vmatprep.subr.bf16.mxu1 %v973_v39 }
  0xab   : > { %972 = vmatpush1.bf16.xpose.msra.mxu0 %v971_v38 }
  0xac   : > { %974 = vmatprep.subr.bf16.mxu0 %v973_v39 }
  0xad   : > { %1001 = vmatpush1.bf16.xpose.msra.mxu1 %v975_v44 }
  0xae   : > { %994 = vmatprep.subr.bf16.mxu1 %v977_v45 }
  0xb3   : > { %976 = vmatpush1.bf16.xpose.msra.mxu0 %v975_v44 }
  0xb4   : > { %978 = vmatprep.subr.bf16.mxu0 %v977_v45 }
  0xb5   : > { %1002 = vmatpush1.bf16.xpose.msra.mxu1 %v979_v50 }
  0xb6   : > { %995 = vmatprep.subr.bf16.mxu1 %v981_v51 }
  0xbb   : > { %980 = vmatpush1.bf16.xpose.msra.mxu0 %v979_v50 }
  0xbc   : > { %982 = vmatprep.subr.bf16.mxu0 %v981_v51 }
  0xbd   : > { %1003 = vmatpush1.bf16.xpose.msra.mxu1 %v983_v56 }
  0xbe   : > { %996 = vmatprep.subr.bf16.mxu1 %v985_v57 }
  0xc3   : > { %984 = vmatpush1.bf16.xpose.msra.mxu0 %v983_v56 }
  0xc4   : > { %986 = vmatprep.subr.bf16.mxu0 %v985_v57 }
  0xc5   : > { %1004 = vmatpush1.bf16.xpose.msra.mxu1 %v987_v60 }
  0xcb   : > { %988 = vmatpush1.bf16.xpose.msra.mxu0 %v987_v60 }
  0xcc   : > { %666 = vmatmul.mubr.f32.vlgmr.msra.gmra.mrb[0].mxu1 %v397_v61 }
  0xcd   : > { %670 = vmatprep.mubr.f32.mxu1 %v400_v62 }
  0xd0   : > { %671 = vmatmul.mubr.f32.gmra.mrb[2].mxu1 %v399_v63 }
  0xd1   : > { %675 = vmatprep.mubr.f32.mxu1 %v402_v0 }
  0xd2   : > { %651 = vmatmul.mubr.f32.vlgmr.msra.gmra.mrb[8].mxu0 %v391_v2 }
  0xd3   : > { %655 = vmatprep.mubr.f32.mxu0 %v394_v4 }
  0xd4   : > { %676 = vmatmul.mubr.f32.gmra.mrb[4].mxu1 %v401_v1 }
  0xd5   : > { %680 = vmatprep.mubr.f32.mxu1 %v404_v3 }
  0xd6   : > { %656 = vmatmul.mubr.f32.gmra.mrb[10].mxu0 %v393_v6 }
  0xd7   : > { %660 = vmatprep.mubr.f32.mxu0 %v396_v8 }
  0xd8   : > { %681 = vmatmul.mubr.f32.gmra.mrb[6].mxu1 %v403_v5 }
  0xd9   : > { %685 = vmatprep.mubr.f32.mxu1 %v406_v7 }
  0xda   : > { %661 = vmatmul.mubr.f32.gmra.mrb[12].mxu0 %v395_v10 }
  0xdc   : > { %686 = vmatmul.mubr.f32.gmra.mrb[8].mxu1 %v405_v9 }
 0x165   : > { %v943_v11 = vpop.f32.mrb[0].mxu0 }
 0x166   : > { %v540_v12 = vpop.f32.mrb[1].mxu0 }
 0x169   : > { %v946_v13 = vpop.f32.mrb[2].mxu0 }
 0x16a   : > { %v550_v14 = vpop.f32.mrb[3].mxu0 }
 0x16d   : > { %v949_v15 = vpop.f32.mrb[4].mxu0 }
 0x16e   : > { %v560_v16 = vpop.f32.mrb[5].mxu0 }
 0x171   : > { %v952_v17 = vpop.f32.mrb[6].mxu0 }
 0x172   : > { %v570_v18 = vpop.f32.mrb[7].mxu0 }
 0x19f   : > { %v667_v20 = vpop.f32.mrb[0].mxu1 }
 0x1a0   : > { %v668_v21 = vadd.f32 %v916_v19, %v667_v20  ;;  %v669_v22 = vpop.f32.mrb[1].mxu1 }
 0x1a2   : > { %v694_v23 = vadd.f32 %v946_v13, %v668_v21 }
 0x1a3   : > { %v672_v24 = vpop.f32.mrb[2].mxu1 }
 0x1a4   : > { %702 = vst [vmem:[%s1788_s28 + $0x18] sm:$0xff] %v694_v23  ;;  %v673_v25 = vadd.f32 %v916_v19, %v672_v24  ;;  %v674_v26 = vpop.f32.mrb[3].mxu1 }
 0x1a5   : > { %v652_v29 = vpop.f32.mrb[8].mxu0 }
 0x1a6   : > { %v695_v27 = vadd.f32 %v673_v25, %v560_v16  ;;  %v653_v31 = vadd.f32 %v916_v19, %v652_v29  ;;  %v654_v33 = vpop.f32.mrb[9].mxu0 }
 0x1a7   : > { %v677_v28 = vpop.f32.mrb[4].mxu1 }
 0x1a8   : > { %703 = vst [vmem:[%s1788_s28 + $0x20] sm:$0xff] %v695_v27  ;;  %v678_v30 = vadd.f32 %v916_v19, %v677_v28  ;;  %v679_v32 = vpop.f32.mrb[5].mxu1  ;;  %v691_v35 = vadd.f32 %v653_v31, %v540_v12 }
 0x1a9   : > { %v657_v37 = vpop.f32.mrb[10].mxu0 }
 0x1aa   : > { %v696_v34 = vadd.f32 %v949_v15, %v678_v30  ;;  %699 = vst [vmem:[%s1788_s28] sm:$0xff] %v691_v35  ;;  %v658_v39 = vadd.f32 %v916_v19, %v657_v37  ;;  %v659_v41 = vpop.f32.mrb[11].mxu0 }
 0x1ab   : > { %v682_v36 = vpop.f32.mrb[6].mxu1 }
 0x1ac   : > { %704 = vst [vmem:[%s1788_s28 + $0x28] sm:$0xff] %v696_v34  ;;  %v683_v38 = vadd.f32 %v916_v19, %v682_v36  ;;  %v684_v40 = vpop.f32.mrb[7].mxu1  ;;  %v692_v43 = vadd.f32 %v943_v11, %v658_v39 }
 0x1ad   : > { %v662_v45 = vpop.f32.mrb[12].mxu0 }
 0x1ae   : > { %v697_v42 = vadd.f32 %v683_v38, %v570_v18  ;;  %700 = vst [vmem:[%s1788_s28 + $0x8] sm:$0xff] %v692_v43  ;;  %v663_v47 = vadd.f32 %v916_v19, %v662_v45  ;;  %v664_v49 = vpop.f32.mrb[13].mxu0 }
 0x1af   : > { %v687_v44 = vpop.f32.mrb[8].mxu1 }
 0x1b0   : > { %705 = vst [vmem:[%s1788_s28 + $0x30] sm:$0xff] %v697_v42  ;;  %v688_v46 = vadd.f32 %v916_v19, %v687_v44  ;;  %v689_v48 = vpop.f32.mrb[9].mxu1  ;;  %v693_v51 = vadd.f32 %v663_v47, %v550_v14 }
 0x1b2   : > { %v698_v50 = vadd.f32 %v952_v17, %v688_v46  ;;  %701 = vst [vmem:[%s1788_s28 + $0x10] sm:$0xff] %v693_v51 }
 0x1b4   : > { %706 = vst [vmem:[%s1788_s28 + $0x38] sm:$0xff] %v698_v50 }
 0x1b5   : > { %1232 = shalt.err (!%p1229_p8)
}
 0x1b6   : > { %s1233_s5 = scalar_lea.hbm %s1805_s21, 1024  ;;  %s1237_s2 = scalar_lea.hbm %s1954_s10, 16384 }
 0x1b7   : > { %p1234_p12 = scmp.ne.s32.totalorder %s1805_s21, %s1233_s5  ;;  %p1238_p4 = scmp.lt.u32.totalorder %s1805_s21, %s1954_s10 }
 0x1b8   : > { %p1239_p6 = scmp.lt.u32.totalorder %s1237_s2, %s1233_s5  ;;  %p1241_p13 = scmp.lt.u32.totalorder %s1233_s5, %s1805_s21 }
 0x1b9   : > { %p1235_p9 = pnand %p1234_p12, %p1955_p10 }
 0x1ba   : > { %p1240_p5 = por %p1239_p6, %p1238_p4 }
 0x1bb   : > { %p1236_p11 = pneg %p1235_p9 }
 0x1bc   : > { %p1242_p1 = por %p1241_p13, %p1240_p5 }
 0x1be   : > { %p1243_p0 = pnand %p1242_p1, %p1236_p11 }
 0x1c0   : > { %1246 = shalt.err (!%p1243_p0)
}
 0x1c1   : > { %s1394_s16 = smov 128   ;;  %s1395_s1 = smov 256  }
 0x1c2   : > { %s1396_s13 = smov 8  }
 0x1c3   : > { %1009 = dma.vmem_to_hbm [thread:$0]  (%p1955_p10), %s1798_s18, 1024, %s1805_s21, %s1811_s19, %s1394_s16, %s1395_s1, %s1396_s13  }
 0x1c4 PF: > { %s1956_s11 = sld [smem:[#allocation11_spill]]  ;;  %p1023_p2 = scmp.ge.s32.totalorder %s1385_s8, 2 }
 0x1c5   : > { %p1957_p7 = scmp.ne.s32.totalorder %s1935_s29, 0 }
 0x1c7   : > { %p1019_p3 = pnand %p1023_p2, %p1957_p7 }
 0x1ca   : > { %s740_s14 = sand.u32 1, %s1956_s11  }
 0x1cb   : > { %s741_s5 = scalar_lea.sflag [#allocation4], %s740_s14 }
 0x1cc   : > { %1320 = dma.done.wait (!%p1019_p3), %s741_s5, 1024  }
 0x1cd   : > { %1322 = vsyncadd (!%p1019_p3), %s741_s5, 4294966272  ;;  %s24_s8 = sadd.s32 1, %s1385_s8   ;;  %s1959_s18 = sld [smem:[#allocation12_spill]] }
 0x1ce   : > { %p1840_p8 = scmp.ge.s32.totalorder %s24_s8, 18   ;;  %s1960_s17 = sld [smem:[#allocation16_spill]] }
 0x1cf   : > { %s1961_s2 = sld [smem:[#allocation17_spill]]  ;;  %s1962_s12 = sld [smem:[#allocation18_spill]] }
 0x1d0   : > { %s1964_s19 = smov %s1333_s20  ;;  %s1965_s20 = smov %s1570_s15 }
 0x1d1   : > { %s1966_s21 = smov %s1341_s22  ;;  %s1967_s22 = smov %s1345_s23 }
 0x1d2   : > { %s1968_s23 = smov %s1629_s4  ;;  %s1969_s24 = smov %s1353_s25 }
 0x1d3   : > { %s1970_s25 = smov %s1357_s26  ;;  %s1971_s26 = smov %s1565_s27 }
 0x1d4   : > { %s1972_s27 = smov %s1373_s30  ;;  %s1973_s28 = smov %s1377_s6 }
 0x1d5   : > { %s1974_s29 = smov %s1381_s7  ;;  %s1975_s30 = smov %s1960_s17 }
 0x1d6   : > { %s1976_s6 = smov %s1961_s2  ;;  %s1977_s7 = smov %s1962_s12 }
 0x1d7   :  { %23 = sbr.rel (!%p1840_p8) target bundleno = 18 (0x12), region = 107 }
 0x1de   :  { %746 = vsyncpa [#allocation3], 1 }
 0x1df   :  { %748 = vsyncpa [#allocation3 + $0x1], 1 }
 0x1e0   :  { %749 = vsyncpa [#allocation6], 1 }
 0x1e1   :  { %751 = vsyncpa [#allocation6 + $0x1], 1 }
 0x1e2   :  { %752 = vsyncpa [#allocation4], 1 }
 0x1e3   :  { %754 = vsyncpa [#allocation4 + $0x1], 1 }

</bundles_post_ra>
